<compile_context>
chip_gen: v6e
topology: v6e:2x2x1
jax: 0.10.0
libtpu: 0.0.40
codegen_flags: <defaults>
</compile_context>

<pallas_src>
import jax
import jax.numpy as jnp
from jax.experimental import pallas as pl
from jax.experimental.pallas import tpu as pltpu

DIM = 64
POS_VOCAB = 1400
NUM_GROUPS = 8
TAB_ROWS = POS_VOCAB + NUM_GROUPS          # 1408 = 11 * 128  (lane/sublane friendly)
LN_EPS = 1e-5


def _round_up(x, m):
    return (x + m - 1) // m * m


# ----------------------------------------------------------------------------
# Kernel
# ----------------------------------------------------------------------------
def critic_kernel(pos_ref, grp_ref,            # (TB, 1) int32 indices (grp pre-offset by POS_VOCAB)
                  tab_ref,                     # (1408, 128) packed embedding table
                  w12_ref, b12_ref,            # (128, 128) block-diag, (1, 128)
                  lng_ref, lnb_ref,            # (1, 64) LayerNorm gamma / beta
                  fc2w_ref, fc2b_ref,          # (64, 64), (1, 64)
                  svw_ref, svb_ref,            # (1, 64) value-head row, (1, 1)
                  out_ref):                    # (TB, 1) f32
    cdt = tab_ref.dtype                        # matmul operand dtype (f32 or bf16)
    tb = pos_ref.shape[0]
    rows = tab_ref.shape[0]

    # ---- fused embedding gather: exact "two-hot" matmul on the MXU ----------
    # table rows [0, 1400) = [pos_emb | 0], rows [1400, 1408) = [0 | grp_emb],
    # so a row with ones at pos_idx and POS_VOCAB + group_id selects
    # [pos_e | grp_e] in a single (TB, 1408) x (1408, 128) matmul.
    lane = jax.lax.broadcasted_iota(jnp.int32, (tb, rows), 1)
    hit = (lane == pos_ref[...]) | (lane == grp_ref[...])
    two_hot = jnp.where(hit, 1.0, 0.0).astype(cdt)
    emb = jnp.dot(two_hot, tab_ref[...],
                  preferred_element_type=jnp.float32)            # (TB, 128) f32

    # ---- first layer: block-diagonal [fc1_w, 0; 0, W_g], K = N = 128 --------
    h = jnp.dot(emb.astype(cdt), w12_ref[...],
                preferred_element_type=jnp.float32) + b12_ref[...]   # (TB, 128)
    x1_pre = h[:, :DIM]                        # fc1(pos_emb(idx)) pre-activation
    attn = h[:, DIM:]                          # out_proj(v_proj(gfc(grp_emb(gid))))

    x1 = jnp.maximum(x1_pre, 0.0)

    # ---- LayerNorm(64) on the group/attention branch (f32) ------------------
    mean = jnp.mean(attn, axis=-1, keepdims=True)
    cent = attn - mean
    var = jnp.mean(cent * cent, axis=-1, keepdims=True)
    gf = cent * jax.lax.rsqrt(var + LN_EPS) * lng_ref[...] + lnb_ref[...]

    x1 = x1 + gf

    # ---- x2 = relu(fc2(x1)) --------------------------------------------------
    x2 = jnp.maximum(
        jnp.dot(x1.astype(cdt), fc2w_ref[...],
                preferred_element_type=jnp.float32) + fc2b_ref[...], 0.0)

    # ---- value head: VPU multiply + XLU lane reduce (instead of N=1 matmul) --
    out_ref[...] = (jnp.sum(x2 * svw_ref[...], axis=-1, keepdims=True)
                    + svb_ref[...]).astype(out_ref.dtype)


# ----------------------------------------------------------------------------
# Parameters (PyTorch-style, linears pre-transposed to (in, out))
# ----------------------------------------------------------------------------
def make_params(key):
    ks = jax.random.split(key, 16)

    def dense(k, fan_in, fan_out):
        return jax.random.normal(k, (fan_in, fan_out), jnp.float32) / jnp.sqrt(fan_in)

    return dict(
        pos_emb=jax.random.normal(ks[0], (POS_VOCAB, DIM), jnp.float32) * 0.02,
        grp_emb=jax.random.normal(ks[1], (NUM_GROUPS, DIM), jnp.float32) * 0.02,
        fc1_w=dense(ks[2], DIM, DIM),
        fc1_b=jax.random.normal(ks[3], (1, DIM), jnp.float32) * 0.01,
        gfc_w=dense(ks[4], DIM, DIM),
        gfc_b=jax.random.normal(ks[5], (1, DIM), jnp.float32) * 0.01,
        v_w=dense(ks[6], DIM, DIM),        # v slice of in_proj_weight (transposed)
        v_b=jax.random.normal(ks[7], (1, DIM), jnp.float32) * 0.01,
        o_w=dense(ks[8], DIM, DIM),        # out_proj weight (transposed)
        o_b=jax.random.normal(ks[9], (1, DIM), jnp.float32) * 0.01,
        ln_g=jnp.ones((1, DIM), jnp.float32),
        ln_b=jnp.zeros((1, DIM), jnp.float32),
        fc2_w=dense(ks[10], DIM, DIM),
        fc2_b=jax.random.normal(ks[11], (1, DIM), jnp.float32) * 0.01,
        sv_w=dense(ks[12], DIM, 1),
        sv_b=jax.random.normal(ks[13], (1, 1), jnp.float32) * 0.01,
    )


def fold_critic_params(p, compute_dtype=jnp.float32):
    """Exact algebraic pre-folds (done ONCE, outside the per-call path)."""
    f32 = jnp.float32
    # group path gfc -> v_proj -> out_proj: no nonlinearity => exact fold
    w_g = (p["gfc_w"] @ p["v_w"]) @ p["o_w"]                              # (64, 64)
    b_g = (p["gfc_b"] @ p["v_w"] + p["v_b"]) @ p["o_w"] + p["o_b"]        # (1, 64)

    # block-diagonal first layer: [pos_e | grp_e] @ W12 + b12 = [x1_pre | attn_pre]
    z = jnp.zeros((DIM, DIM), f32)
    w12 = jnp.block([[p["fc1_w"], z], [z, w_g]])                          # (128, 128)
    b12 = jnp.concatenate([p["fc1_b"], b_g], axis=-1)                     # (1, 128)

    # packed gather table: rows [0,1400) -> [pos_emb | 0]; [1400,1408) -> [0 | grp_emb]
    pos_rows = jnp.concatenate(
        [p["pos_emb"], jnp.zeros((POS_VOCAB, DIM), f32)], axis=-1)
    grp_rows = jnp.concatenate(
        [jnp.zeros((NUM_GROUPS, DIM), f32), p["grp_emb"]], axis=-1)
    emb_tab = jnp.concatenate([pos_rows, grp_rows], axis=0)               # (1408, 128)

    return dict(
        emb_tab=emb_tab.astype(compute_dtype),
        w12=w12.astype(compute_dtype),
        b12=b12,
        ln_g=p["ln_g"], ln_b=p["ln_b"],
        fc2_w=p["fc2_w"].astype(compute_dtype), fc2_b=p["fc2_b"],
        sv_w=p["sv_w"].reshape(1, DIM),        # row vector for the VPU value head
        sv_b=p["sv_b"],
    )


# ----------------------------------------------------------------------------
# Wrapper: single pallas_call, batch grid
# ----------------------------------------------------------------------------
def critic_forward(x, group_id, folded, *, block_b=None):
    """x: (B, F) float32 (column 0 holds position indices); group_id: (B,) int."""
    B = x.shape[0]
    pos_idx = x[:, 0].astype(jnp.int32)
    grp_idx = group_id.astype(jnp.int32) + POS_VOCAB    # offset into packed table

    if block_b is None:
        block_b = min(_round_up(B, 8), 512)             # >=256 fills v6e/v7x MXU rows
    Bp = _round_up(B, block_b)
    pad = Bp - B
    if pad:
        pos_idx = jnp.pad(pos_idx, (0, pad))
        grp_idx = jnp.pad(grp_idx, (0, pad), constant_values=POS_VOCAB)
    pos_col = pos_idx.reshape(Bp, 1)
    grp_col = grp_idx.reshape(Bp, 1)

    grid = (Bp // block_b,)

    def _const(shape):
        # weights: same block every grid step -> stays resident in VMEM
        return pl.BlockSpec(shape, lambda i: (0, 0))

    in_specs = [
        pl.BlockSpec((block_b, 1), lambda i: (i, 0)),    # pos indices
        pl.BlockSpec((block_b, 1), lambda i: (i, 0)),    # group indices (offset)
        _const(folded["emb_tab"].shape),
        _const(folded["w12"].shape),
        _const(folded["b12"].shape),
        _const(folded["ln_g"].shape),
        _const(folded["ln_b"].shape),
        _const(folded["fc2_w"].shape),
        _const(folded["fc2_b"].shape),
        _const(folded["sv_w"].shape),
        _const(folded["sv_b"].shape),
    ]
    out_specs = pl.BlockSpec((block_b, 1), lambda i: (i, 0))

    out = pl.pallas_call(
        critic_kernel,
        grid=grid,
        in_specs=in_specs,
        out_specs=out_specs,
        out_shape=jax.ShapeDtypeStruct((Bp, 1), jnp.float32),
        compiler_params=pltpu.CompilerParams(
            dimension_semantics=("parallel",)),          # megacore / v7x 2-TC sharding
    )(pos_col, grp_col,
      folded["emb_tab"], folded["w12"], folded["b12"],
      folded["ln_g"], folded["ln_b"],
      folded["fc2_w"], folded["fc2_b"],
      folded["sv_w"], folded["sv_b"])
    return out[:B]


# ----------------------------------------------------------------------------
# Pure-JAX reference (mirrors the PyTorch forward, unfolded)
# ----------------------------------------------------------------------------
def critic_ref(x, group_id, params):
    pos_idx = x[:, 0].astype(jnp.int32)
    pos_e = jnp.take(params["pos_emb"], pos_idx, axis=0)
    x1 = jax.nn.relu(pos_e @ params["fc1_w"] + params["fc1_b"])
    g = jnp.take(params["grp_emb"], group_id, axis=0) @ params["gfc_w"] + params["gfc_b"]
    attn = (g @ params["v_w"] + params["v_b"]) @ params["o_w"] + params["o_b"]
    mean = attn.mean(-1, keepdims=True)
    var = ((attn - mean) ** 2).mean(-1, keepdims=True)
    gf = (attn - mean) / jnp.sqrt(var + LN_EPS) * params["ln_g"] + params["ln_b"]
    x1 = x1 + gf
    x2 = jax.nn.relu(x1 @ params["fc2_w"] + params["fc2_b"])
    return x2 @ params["sv_w"] + params["sv_b"]


if __name__ == "__main__":
    key = jax.random.PRNGKey(0)
    kp, kx, kg = jax.random.split(key, 3)
    params = make_params(kp)

    B = 8
    # x mimics the state tensor: column 0 holds position indices (cast to long in torch)
    pos_ids = jax.random.randint(kx, (B,), 0, POS_VOCAB).astype(jnp.float32)
    x = jnp.stack([pos_ids, jnp.zeros((B,), jnp.float32)], axis=1)     # (B, 2)
    group_id = jax.random.randint(kg, (B,), 0, NUM_GROUPS).astype(jnp.int32)

    ref = jax.block_until_ready(critic_ref(x, group_id, params))

    # f32 operand path: tight correctness check against the unfolded reference.
    folded_f32 = fold_critic_params(params, jnp.float32)
    out = jax.block_until_ready(critic_forward(x, group_id, folded_f32))
    assert out.shape == (B, 1)
    assert jnp.allclose(out, ref, atol=1e-4, rtol=1e-4), (out, ref)

    # bf16 matmul-operand fast path (v5e/v6e/v7x MXU guidance): f32 accumulation
    # and f32 LayerNorm/elementwise; looser numerical smoke check.
    folded_bf16 = fold_critic_params(params, jnp.bfloat16)
    out_bf16 = jax.block_until_ready(critic_forward(x, group_id, folded_bf16))
    assert out_bf16.shape == (B, 1)
    assert bool(jnp.all(jnp.isfinite(out_bf16)))
    assert jnp.allclose(out_bf16, ref, atol=0.25, rtol=0.25), (out_bf16, ref)

    print("KERNEL_OK")
</pallas_src>

<mosaic_0001>
module attributes {stable_mosaic.version = 11 : i64} {
  func.func @critic_kernel(%arg0: i32, %arg1: memref<8x1xi32, #tpu.memory_space<vmem>>, %arg2: memref<8x1xi32, #tpu.memory_space<vmem>>, %arg3: memref<1408x128xf32, #tpu.memory_space<vmem>>, %arg4: memref<128x128xf32, #tpu.memory_space<vmem>>, %arg5: memref<1x128xf32, #tpu.memory_space<vmem>>, %arg6: memref<1x64xf32, #tpu.memory_space<vmem>>, %arg7: memref<1x64xf32, #tpu.memory_space<vmem>>, %arg8: memref<64x64xf32, #tpu.memory_space<vmem>>, %arg9: memref<1x64xf32, #tpu.memory_space<vmem>>, %arg10: memref<1x64xf32, #tpu.memory_space<vmem>>, %arg11: memref<1x1xf32, #tpu.memory_space<vmem>>, %arg12: memref<8x1xf32, #tpu.memory_space<vmem>>) attributes {dimension_semantics = [#tpu.dimension_semantics<parallel>], iteration_bounds = array<i64: 1>, scalar_prefetch = 0 : i64, scratch_operands = 0 : i64, tpu.core_type = #tpu.core_type<tc>, window_params = [{transform_indices = @transform_0, window_bounds = array<i64: 8, 1>}, {transform_indices = @transform_1, window_bounds = array<i64: 8, 1>}, {pipeline_mode = #tpu.pipeline_mode<synchronous>, transform_indices = @transform_2, window_bounds = array<i64: 1408, 128>}, {pipeline_mode = #tpu.pipeline_mode<synchronous>, transform_indices = @transform_3, window_bounds = array<i64: 128, 128>}, {pipeline_mode = #tpu.pipeline_mode<synchronous>, transform_indices = @transform_4, window_bounds = array<i64: 1, 128>}, {pipeline_mode = #tpu.pipeline_mode<synchronous>, transform_indices = @transform_5, window_bounds = array<i64: 1, 64>}, {pipeline_mode = #tpu.pipeline_mode<synchronous>, transform_indices = @transform_6, window_bounds = array<i64: 1, 64>}, {pipeline_mode = #tpu.pipeline_mode<synchronous>, transform_indices = @transform_7, window_bounds = array<i64: 64, 64>}, {pipeline_mode = #tpu.pipeline_mode<synchronous>, transform_indices = @transform_8, window_bounds = array<i64: 1, 64>}, {pipeline_mode = #tpu.pipeline_mode<synchronous>, transform_indices = @transform_9, window_bounds = array<i64: 1, 64>}, {pipeline_mode = #tpu.pipeline_mode<synchronous>, transform_indices = @transform_10, window_bounds = array<i64: 1, 1>}, {transform_indices = @transform_11, window_bounds = array<i64: 8, 1>}]} {
    %0 = tpu.iota {dimensions = array<i32: 1>} : vector<8x1408xi32>
    %c0 = arith.constant 0 : index
    %c0_0 = arith.constant 0 : index
    %1 = vector.load %arg1[%c0, %c0_0] : memref<8x1xi32, #tpu.memory_space<vmem>>, vector<8x1xi32>
    %2 = vector.broadcast %1 : vector<8x1xi32> to vector<8x1408xi32>
    %3 = arith.cmpi eq, %0, %2 : vector<8x1408xi32>
    %c0_1 = arith.constant 0 : index
    %c0_2 = arith.constant 0 : index
    %4 = vector.load %arg2[%c0_1, %c0_2] : memref<8x1xi32, #tpu.memory_space<vmem>>, vector<8x1xi32>
    %5 = vector.broadcast %4 : vector<8x1xi32> to vector<8x1408xi32>
    %6 = arith.cmpi eq, %0, %5 : vector<8x1408xi32>
    %7 = arith.ori %3, %6 : vector<8x1408xi1>
    %cst = arith.constant 1.000000e+00 : f32
    %cst_3 = arith.constant 0.000000e+00 : f32
    %8 = vector.broadcast %cst : f32 to vector<8x1408xf32>
    %9 = vector.broadcast %cst_3 : f32 to vector<8x1408xf32>
    %10 = arith.select %7, %8, %9 : vector<8x1408xi1>, vector<8x1408xf32>
    %c0_4 = arith.constant 0 : index
    %c0_5 = arith.constant 0 : index
    %11 = vector.load %arg3[%c0_4, %c0_5] : memref<1408x128xf32, #tpu.memory_space<vmem>>, vector<1408x128xf32>
    %cst_6 = arith.constant dense<0.000000e+00> : vector<8x128xf32>
    %12 = tpu.matmul %10, %11, %cst_6 {dimension_numbers = #tpu.dot_dimension_numbers<[1], [0], [0], [1], [0, 0, 1, 1], [], []>} : vector<8x1408xf32>, vector<1408x128xf32>, vector<8x128xf32> -> vector<8x128xf32>
    %c0_7 = arith.constant 0 : index
    %c0_8 = arith.constant 0 : index
    %13 = vector.load %arg4[%c0_7, %c0_8] : memref<128x128xf32, #tpu.memory_space<vmem>>, vector<128x128xf32>
    %cst_9 = arith.constant dense<0.000000e+00> : vector<8x128xf32>
    %14 = tpu.matmul %12, %13, %cst_9 {dimension_numbers = #tpu.dot_dimension_numbers<[1], [0], [0], [1], [0, 0, 1, 1], [], []>} : vector<8x128xf32>, vector<128x128xf32>, vector<8x128xf32> -> vector<8x128xf32>
    %c0_10 = arith.constant 0 : index
    %c0_11 = arith.constant 0 : index
    %15 = vector.load %arg5[%c0_10, %c0_11] : memref<1x128xf32, #tpu.memory_space<vmem>>, vector<1x128xf32>
    %16 = vector.broadcast %15 : vector<1x128xf32> to vector<8x128xf32>
    %17 = arith.addf %14, %16 : vector<8x128xf32>
    %18 = vector.extract_strided_slice %17 {offsets = [0, 0], sizes = [8, 64], strides = [1, 1]} : vector<8x128xf32> to vector<8x64xf32>
    %19 = vector.extract_strided_slice %17 {offsets = [0, 64], sizes = [8, 64], strides = [1, 1]} : vector<8x128xf32> to vector<8x64xf32>
    %cst_12 = arith.constant 0.000000e+00 : f32
    %20 = vector.broadcast %cst_12 : f32 to vector<8x64xf32>
    %21 = arith.maximumf %18, %20 : vector<8x64xf32>
    %cst_13 = arith.constant dense<0.000000e+00> : vector<8xf32>
    %22 = vector.multi_reduction <add>, %19, %cst_13 [1] : vector<8x64xf32> to vector<8xf32>
    %23 = vector.shape_cast %22 : vector<8xf32> to vector<8x1xf32>
    %cst_14 = arith.constant 6.400000e+01 : f32
    %24 = vector.broadcast %cst_14 : f32 to vector<8x1xf32>
    %25 = arith.divf %23, %24 : vector<8x1xf32>
    %26 = vector.broadcast %25 : vector<8x1xf32> to vector<8x64xf32>
    %27 = arith.subf %19, %26 : vector<8x64xf32>
    %28 = arith.mulf %27, %27 : vector<8x64xf32>
    %cst_15 = arith.constant dense<0.000000e+00> : vector<8xf32>
    %29 = vector.multi_reduction <add>, %28, %cst_15 [1] : vector<8x64xf32> to vector<8xf32>
    %30 = vector.shape_cast %29 : vector<8xf32> to vector<8x1xf32>
    %cst_16 = arith.constant 6.400000e+01 : f32
    %31 = vector.broadcast %cst_16 : f32 to vector<8x1xf32>
    %32 = arith.divf %30, %31 : vector<8x1xf32>
    %cst_17 = arith.constant 9.99999974E-6 : f32
    %33 = vector.broadcast %cst_17 : f32 to vector<8x1xf32>
    %34 = arith.addf %32, %33 : vector<8x1xf32>
    %35 = math.rsqrt %34 : vector<8x1xf32>
    %36 = vector.broadcast %35 : vector<8x1xf32> to vector<8x64xf32>
    %37 = arith.mulf %27, %36 : vector<8x64xf32>
    %c0_18 = arith.constant 0 : index
    %c0_19 = arith.constant 0 : index
    %38 = vector.load %arg6[%c0_18, %c0_19] : memref<1x64xf32, #tpu.memory_space<vmem>>, vector<1x64xf32>
    %39 = vector.broadcast %38 : vector<1x64xf32> to vector<8x64xf32>
    %40 = arith.mulf %37, %39 : vector<8x64xf32>
    %c0_20 = arith.constant 0 : index
    %c0_21 = arith.constant 0 : index
    %41 = vector.load %arg7[%c0_20, %c0_21] : memref<1x64xf32, #tpu.memory_space<vmem>>, vector<1x64xf32>
    %42 = vector.broadcast %41 : vector<1x64xf32> to vector<8x64xf32>
    %43 = arith.addf %40, %42 : vector<8x64xf32>
    %44 = arith.addf %21, %43 : vector<8x64xf32>
    %c0_22 = arith.constant 0 : index
    %c0_23 = arith.constant 0 : index
    %45 = vector.load %arg8[%c0_22, %c0_23] : memref<64x64xf32, #tpu.memory_space<vmem>>, vector<64x64xf32>
    %cst_24 = arith.constant dense<0.000000e+00> : vector<8x64xf32>
    %46 = tpu.matmul %44, %45, %cst_24 {dimension_numbers = #tpu.dot_dimension_numbers<[1], [0], [0], [1], [0, 0, 1, 1], [], []>} : vector<8x64xf32>, vector<64x64xf32>, vector<8x64xf32> -> vector<8x64xf32>
    %c0_25 = arith.constant 0 : index
    %c0_26 = arith.constant 0 : index
    %47 = vector.load %arg9[%c0_25, %c0_26] : memref<1x64xf32, #tpu.memory_space<vmem>>, vector<1x64xf32>
    %48 = vector.broadcast %47 : vector<1x64xf32> to vector<8x64xf32>
    %49 = arith.addf %46, %48 : vector<8x64xf32>
    %cst_27 = arith.constant 0.000000e+00 : f32
    %50 = vector.broadcast %cst_27 : f32 to vector<8x64xf32>
    %51 = arith.maximumf %49, %50 : vector<8x64xf32>
    %c0_28 = arith.constant 0 : index
    %c0_29 = arith.constant 0 : index
    %52 = vector.load %arg10[%c0_28, %c0_29] : memref<1x64xf32, #tpu.memory_space<vmem>>, vector<1x64xf32>
    %53 = vector.broadcast %52 : vector<1x64xf32> to vector<8x64xf32>
    %54 = arith.mulf %51, %53 : vector<8x64xf32>
    %cst_30 = arith.constant dense<0.000000e+00> : vector<8xf32>
    %55 = vector.multi_reduction <add>, %54, %cst_30 [1] : vector<8x64xf32> to vector<8xf32>
    %56 = vector.shape_cast %55 : vector<8xf32> to vector<8x1xf32>
    %c0_31 = arith.constant 0 : index
    %c0_32 = arith.constant 0 : index
    %57 = vector.load %arg11[%c0_31, %c0_32] : memref<1x1xf32, #tpu.memory_space<vmem>>, vector<1x1xf32>
    %58 = vector.broadcast %57 : vector<1x1xf32> to vector<8x1xf32>
    %59 = arith.addf %56, %58 : vector<8x1xf32>
    %c0_33 = arith.constant 0 : index
    %c0_34 = arith.constant 0 : index
    %60 = vector.load %arg12[%c0_33, %c0_34] : memref<8x1xf32, #tpu.memory_space<vmem>>, vector<8x1xf32>
    tpu.vector_store %arg12[%c0_33, %c0_34], %59 {strides = array<i32>} : memref<8x1xf32, #tpu.memory_space<vmem>>, vector<8x1xf32>,
    return
  }
  func.func @transform_0(%arg0: i32) -> (i32, i32) {
    %c0_i32 = arith.constant 0 : i32
    %c0_i32_0 = arith.constant 0 : i32
    return %arg0, %c0_i32 : i32, i32
  }
  func.func @transform_1(%arg0: i32) -> (i32, i32) {
    %c0_i32 = arith.constant 0 : i32
    %c0_i32_0 = arith.constant 0 : i32
    return %arg0, %c0_i32 : i32, i32
  }
  func.func @transform_2(%arg0: i32) -> (i32, i32) {
    %c0_i32 = arith.constant 0 : i32
    %c0_i32_0 = arith.constant 0 : i32
    %c0_i32_1 = arith.constant 0 : i32
    return %c0_i32, %c0_i32_0 : i32, i32
  }
  func.func @transform_3(%arg0: i32) -> (i32, i32) {
    %c0_i32 = arith.constant 0 : i32
    %c0_i32_0 = arith.constant 0 : i32
    %c0_i32_1 = arith.constant 0 : i32
    return %c0_i32, %c0_i32_0 : i32, i32
  }
  func.func @transform_4(%arg0: i32) -> (i32, i32) {
    %c0_i32 = arith.constant 0 : i32
    %c0_i32_0 = arith.constant 0 : i32
    %c0_i32_1 = arith.constant 0 : i32
    return %c0_i32, %c0_i32_0 : i32, i32
  }
  func.func @transform_5(%arg0: i32) -> (i32, i32) {
    %c0_i32 = arith.constant 0 : i32
    %c0_i32_0 = arith.constant 0 : i32
    %c0_i32_1 = arith.constant 0 : i32
    return %c0_i32, %c0_i32_0 : i32, i32
  }
  func.func @transform_6(%arg0: i32) -> (i32, i32) {
    %c0_i32 = arith.constant 0 : i32
    %c0_i32_0 = arith.constant 0 : i32
    %c0_i32_1 = arith.constant 0 : i32
    return %c0_i32, %c0_i32_0 : i32, i32
  }
  func.func @transform_7(%arg0: i32) -> (i32, i32) {
    %c0_i32 = arith.constant 0 : i32
    %c0_i32_0 = arith.constant 0 : i32
    %c0_i32_1 = arith.constant 0 : i32
    return %c0_i32, %c0_i32_0 : i32, i32
  }
  func.func @transform_8(%arg0: i32) -> (i32, i32) {
    %c0_i32 = arith.constant 0 : i32
    %c0_i32_0 = arith.constant 0 : i32
    %c0_i32_1 = arith.constant 0 : i32
    return %c0_i32, %c0_i32_0 : i32, i32
  }
  func.func @transform_9(%arg0: i32) -> (i32, i32) {
    %c0_i32 = arith.constant 0 : i32
    %c0_i32_0 = arith.constant 0 : i32
    %c0_i32_1 = arith.constant 0 : i32
    return %c0_i32, %c0_i32_0 : i32, i32
  }
  func.func @transform_10(%arg0: i32) -> (i32, i32) {
    %c0_i32 = arith.constant 0 : i32
    %c0_i32_0 = arith.constant 0 : i32
    %c0_i32_1 = arith.constant 0 : i32
    return %c0_i32, %c0_i32_0 : i32, i32
  }
  func.func @transform_11(%arg0: i32) -> (i32, i32) {
    %c0_i32 = arith.constant 0 : i32
    %c0_i32_0 = arith.constant 0 : i32
    return %arg0, %c0_i32 : i32, i32
  }
}

</mosaic_0001>

<bundles_post_ra>
// kernel: tpu_custom_call.1
= control target key start
LH: loop header
LB: loop body
LE: loop exit
PB: predicated region body
PF: predicated region fallthrough
CT: control target
= control target key end

     0   :  { %s1612_s0 = inlined_call_operand.vmem [shape: s32[8,1], index: 0, kind: input, shape index: {}]   ;;  %s1613_s1 = inlined_call_operand.vmem [shape: s32[8,1], index: 1, kind: input, shape index: {}]   ;;  %s1614_s2 = inlined_call_operand.hbm [shape: f32[1408,128], index: 2, kind: input, shape index: {}]   ;;  %s1615_s3 = inlined_call_operand.hbm [shape: f32[128,128], index: 3, kind: input, shape index: {}]   ;;  %s1616_s4 = inlined_call_operand.vmem [shape: f32[1,128], index: 4, kind: input, shape index: {}]   ;;  %s1617_s5 = inlined_call_operand.vmem [shape: f32[1,64], index: 5, kind: input, shape index: {}]   ;;  %s1618_s6 = inlined_call_operand.vmem [shape: f32[1,64], index: 6, kind: input, shape index: {}]   ;;  %s1619_s7 = inlined_call_operand.hbm [shape: f32[64,64], index: 7, kind: input, shape index: {}]   ;;  %s1620_s8 = inlined_call_operand.vmem [shape: f32[1,64], index: 8, kind: input, shape index: {}]   ;;  %s1621_s9 = inlined_call_operand.vmem [shape: f32[1,64], index: 9, kind: input, shape index: {}]   ;;  %s1622_s10 = inlined_call_operand.<no memory space> [shape: f32[1,1], index: 10, kind: input, shape index: {}]   ;;  %s1623_s11 = inlined_call_operand.vmem [shape: f32[8,1], index: 11, kind: output, shape index: {}]  }
   0x1   :  { %v16_v0 = vstv %s1622_s10 }
   0x2   :  { %17 = vst [vmem:[#allocation2] sm:$0x1] %v16_v0 }
   0x3   :  { %18 = vsyncpa [#allocation4], 0 }
   0x4   :  { %19 = vsyncpa [#allocation6], 0  ;;  %s1401_s19 = smov [#allocation5]   ;;  %s1402_s21 = smov [#allocation3]  }
   0x5   :  { %s41_s20 = sshll.u32 %s1401_s19, 4  ;;  %s29_s22 = sshll.u32 %s1402_s21, 4  ;;  %s42_s20 = int_to_ptr.vmem [resolvable:$true] %s41_s20  ;;  %s30_s22 = int_to_ptr.vmem [resolvable:$true] %s29_s22 }
   0x6   :  { %s1345_s23 = scalar_lea.vmem %s42_s20, 2048  ;;  %p1350_p1 = scmp.lt.s32.totalorder %s42_s20, %s42_s20 }
   0x7   :  { %p1346_p0 = scmp.ne.s32.totalorder %s42_s20, %s1345_s23  ;;  %p1351_p2 = scmp.lt.s32.totalorder %s1345_s23, %s1345_s23 }
   0x9   :  { %p1352_p3 = por %p1351_p2, %p1350_p1 }
   0xb   :  { %p1353_p4 = pnand %p1352_p3, %p1346_p0 }
   0xd   :  { %1356 = shalt.err (!%p1353_p4)
}
   0xe   :  { %s1403_s24 = smov 128   ;;  %s1404_s25 = smov 8  }
   0xf   :  { %47 = dma.hbm_to_vmem [thread:$0]  %s1615_s3, 2048, %s42_s20, [#allocation6], %s1403_s24, %s1403_s24, %s1404_s25  }
  0x10   :  { %s1365_s27 = scalar_lea.vmem %s30_s22, 22528  ;;  %p1370_p6 = scmp.lt.s32.totalorder %s30_s22, %s30_s22 }
  0x11   :  { %p1366_p5 = scmp.ne.s32.totalorder %s30_s22, %s1365_s27  ;;  %p1371_p7 = scmp.lt.s32.totalorder %s1365_s27, %s1365_s27 }
  0x13   :  { %p1372_p8 = por %p1371_p7, %p1370_p6 }
  0x15   :  { %p1373_p9 = pnand %p1372_p8, %p1366_p5 }
  0x17   :  { %1376 = shalt.err (!%p1373_p9)
}
  0x18   :  { %35 = dma.hbm_to_vmem [thread:$0]  %s1614_s2, 22528, %s30_s22, [#allocation4], %s1403_s24, %s1403_s24, %s1404_s25  }
  0x19   :  { %s1405_s30 = smov [#allocation7]  }
  0x1a   :  { %s59_s12 = sshll.u32 %s1405_s30, 4  ;;  %s60_s12 = int_to_ptr.vmem [resolvable:$true] %s59_s12 }
  0x1b   :  { %s1385_s13 = scalar_lea.vmem %s60_s12, 1024  ;;  %p1390_p11 = scmp.lt.s32.totalorder %s60_s12, %s60_s12 }
  0x1c   :  { %p1386_p10 = scmp.ne.s32.totalorder %s60_s12, %s1385_s13  ;;  %p1391_p12 = scmp.lt.s32.totalorder %s1385_s13, %s1385_s13 }
  0x1e   :  { %p1392_p13 = por %p1391_p12, %p1390_p11 }
  0x20   :  { %p1393_p0 = pnand %p1392_p13, %p1386_p10 }
  0x22   :  { %1396 = shalt.err (!%p1393_p0)
}
  0x23   :  { %65 = dma.hbm_to_vmem [thread:$0]  %s1619_s7, 1024, %s60_s12, [#allocation6], %s1403_s24, %s1403_s24, %s1404_s25  }
  0x24   :  { %1397 = dma.done.wait [#allocation4], 22528  }
  0x25   :  { %1398 = vsyncadd [#allocation4], 4294944768 }
  0x26   :  { %1399 = dma.done.wait [#allocation6], 3072  }
  0x27   :  { %1400 = vsyncadd [#allocation6], 4294964224  ;;  %v1406_v1 = vmov 0   ;;  %v93_v2 = vld [vmem:[%s1612_s0] sm:$0xff]  ;;  %v175_v8 = vld [vmem:[#allocation3 + $0xf0] sm:$0xff]  ;;  %s1410_s7 = smov 64  }
  0x28   :  { %1334 = vset.pattern.permute.xlu0 %v1406_v1  ;;  %v108_v3 = vld [vmem:[%s1613_s1] sm:$0xff]  ;;  %v207_v9 = vld [vmem:[#allocation3 + $0x1f0] sm:$0xff]  ;;  %v174_v12 = vld [vmem:[#allocation3 + $0xe8] sm:$0xff] }
  0x29   :  { %v176_v4 = vld [vmem:[#allocation3 + $0xf8] sm:$0xff]  ;;  %95 = vperm.xlu0 %1334, %v93_v2   ;;  %v159_v10 = vld [vmem:[#allocation3 + $0x70] sm:$0xff]  ;;  %v206_v13 = vld [vmem:[#allocation3 + $0x1e8] sm:$0xff] }
  0x2a   :  { %1017 = vmatprep.subr.mxu0 %v176_v4  ;;  %v208_v5 = vld [vmem:[#allocation3 + $0x1f8] sm:$0xff]  ;;  %v191_v11 = vld [vmem:[#allocation3 + $0x170] sm:$0xff]  ;;  %v158_v14 = vld [vmem:[#allocation3 + $0x68] sm:$0xff] }
  0x2b   :  { %v160_v6 = vld [vmem:[#allocation3 + $0x78] sm:$0xff]  ;;  %1052 = vmatprep.subr.mxu1 %v208_v5  ;;  %v190_v15 = vld [vmem:[#allocation3 + $0x168] sm:$0xff]  ;;  %v173_v16 = vld [vmem:[#allocation3 + $0xe0] sm:$0xff] }
  0x2c   :  { %v192_v7 = vld [vmem:[#allocation3 + $0x178] sm:$0xff]  ;;  %1018 = vmatpush3.msra.mxu0 %v160_v6  ;;  %v205_v17 = vld [vmem:[#allocation3 + $0x1e0] sm:$0xff]  ;;  %v171_v24 = vld [vmem:[#allocation3 + $0xd0] sm:$0xff]  ;;  %v81_v6 = vlaneseq }
  0x2d   :  { %1053 = vmatpush3.msra.mxu1 %v192_v7  ;;  %1019 = vmatprep.subr.mxu0 %v175_v8  ;;  %v157_v18 = vld [vmem:[#allocation3 + $0x60] sm:$0xff]  ;;  %v172_v20 = vld [vmem:[#allocation3 + $0xd8] sm:$0xff]  ;;  %v203_v25 = vld [vmem:[#allocation3 + $0x1d0] sm:$0xff] }
  0x2e   :  { %1054 = vmatprep.subr.mxu1 %v207_v9  ;;  %1020 = vmatpush3.msra.mxu0 %v159_v10  ;;  %v189_v19 = vld [vmem:[#allocation3 + $0x160] sm:$0xff]  ;;  %v204_v21 = vld [vmem:[#allocation3 + $0x1d8] sm:$0xff]  ;;  %v155_v26 = vld [vmem:[#allocation3 + $0x50] sm:$0xff]  ;;  %v1489_v7 = vand.u32 127, %v81_v6 }
  0x2f   :  { %110 = vperm.xlu0 %1334, %v108_v3   ;;  %1055 = vmatpush3.msra.mxu1 %v191_v11  ;;  %v156_v22 = vld [vmem:[#allocation3 + $0x58] sm:$0xff]  ;;  %v187_v27 = vld [vmem:[#allocation3 + $0x150] sm:$0xff]  ;;  %v170_v28 = vld [vmem:[#allocation3 + $0xc8] sm:$0xff] }
  0x30   :  { %1021 = vmatprep.subr.mxu0 %v174_v12  ;;  %1056 = vmatprep.subr.mxu1 %v206_v13  ;;  %v188_v23 = vld [vmem:[#allocation3 + $0x158] sm:$0xff]  ;;  %v202_v29 = vld [vmem:[#allocation3 + $0x1c8] sm:$0xff]  ;;  %v169_v32 = vld [vmem:[#allocation3 + $0xc0] sm:$0xff]  ;;  %v83_v9 = vadd.s32 128, %v1489_v7  ;;  %v85_v10 = vadd.s32 384, %v1489_v7  ;;  %v84_v12 = vadd.s32 256, %v1489_v7 }
  0x31   :  { %1022 = vmatpush3.msra.mxu0 %v158_v14  ;;  %1057 = vmatpush3.msra.mxu1 %v190_v15  ;;  %v154_v30 = vld [vmem:[#allocation3 + $0x48] sm:$0xff]  ;;  %v201_v33 = vld [vmem:[#allocation3 + $0x1c0] sm:$0xff]  ;;  %v168_v36 = vld [vmem:[#allocation3 + $0xb8] sm:$0xff]  ;;  %v87_v13 = vadd.s32 640, %v1489_v7  ;;  %v1407_v14 = vmov 1.0  }
  0x32   :  { %1023 = vmatprep.subr.mxu0 %v173_v16  ;;  %1058 = vmatprep.subr.mxu1 %v205_v17  ;;  %v186_v31 = vld [vmem:[#allocation3 + $0x148] sm:$0xff]  ;;  %v153_v34 = vld [vmem:[#allocation3 + $0x40] sm:$0xff]  ;;  %v200_v37 = vld [vmem:[#allocation3 + $0x1b8] sm:$0xff]  ;;  %v89_v16 = vadd.s32 896, %v1489_v7 }
  0x33   :  { %1024 = vmatpush3.msra.mxu0 %v157_v18  ;;  %1059 = vmatpush3.msra.mxu1 %v189_v19  ;;  %v185_v35 = vld [vmem:[#allocation3 + $0x140] sm:$0xff]  ;;  %v152_v38 = vld [vmem:[#allocation3 + $0x38] sm:$0xff]  ;;  %v167_v40 = vld [vmem:[#allocation3 + $0xb0] sm:$0xff] }
  0x34   :  { %1025 = vmatprep.subr.mxu0 %v172_v20  ;;  %1060 = vmatprep.subr.mxu1 %v204_v21  ;;  %v184_v39 = vld [vmem:[#allocation3 + $0x138] sm:$0xff]  ;;  %v199_v41 = vld [vmem:[#allocation3 + $0x1b0] sm:$0xff]  ;;  %v166_v44 = vld [vmem:[#allocation3 + $0xa8] sm:$0xff] }
  0x35   :  { %1026 = vmatpush3.msra.mxu0 %v156_v22  ;;  %1061 = vmatpush3.msra.mxu1 %v188_v23  ;;  %v151_v42 = vld [vmem:[#allocation3 + $0x30] sm:$0xff]  ;;  %v198_v45 = vld [vmem:[#allocation3 + $0x1a8] sm:$0xff]  ;;  %v165_v48 = vld [vmem:[#allocation3 + $0xa0] sm:$0xff] }
  0x36   :  { %1027 = vmatprep.subr.mxu0 %v171_v24  ;;  %1062 = vmatprep.subr.mxu1 %v203_v25  ;;  %v183_v43 = vld [vmem:[#allocation3 + $0x130] sm:$0xff]  ;;  %v150_v46 = vld [vmem:[#allocation3 + $0x28] sm:$0xff]  ;;  %v197_v49 = vld [vmem:[#allocation3 + $0x1a0] sm:$0xff] }
  0x37   :  { %1028 = vmatpush3.msra.mxu0 %v155_v26  ;;  %1063 = vmatpush3.msra.mxu1 %v187_v27  ;;  %v182_v47 = vld [vmem:[#allocation3 + $0x128] sm:$0xff]  ;;  %v149_v50 = vld [vmem:[#allocation3 + $0x20] sm:$0xff]  ;;  %v164_v52 = vld [vmem:[#allocation3 + $0x98] sm:$0xff] }
  0x38   :  { %1029 = vmatprep.subr.mxu0 %v170_v28  ;;  %1064 = vmatprep.subr.mxu1 %v202_v29  ;;  %v181_v51 = vld [vmem:[#allocation3 + $0x120] sm:$0xff]  ;;  %v196_v53 = vld [vmem:[#allocation3 + $0x198] sm:$0xff]  ;;  %v163_v56 = vld [vmem:[#allocation3 + $0x90] sm:$0xff] }
  0x39   :  { %1030 = vmatpush3.msra.mxu0 %v154_v30  ;;  %1065 = vmatpush3.msra.mxu1 %v186_v31  ;;  %v148_v54 = vld [vmem:[#allocation3 + $0x18] sm:$0xff]  ;;  %v195_v57 = vld [vmem:[#allocation3 + $0x190] sm:$0xff]  ;;  %v162_v60 = vld [vmem:[#allocation3 + $0x88] sm:$0xff] }
  0x3a   :  { %1031 = vmatprep.subr.mxu0 %v169_v32  ;;  %1066 = vmatprep.subr.mxu1 %v201_v33  ;;  %v180_v55 = vld [vmem:[#allocation3 + $0x118] sm:$0xff]  ;;  %v147_v58 = vld [vmem:[#allocation3 + $0x10] sm:$0xff]  ;;  %v194_v61 = vld [vmem:[#allocation3 + $0x188] sm:$0xff] }
  0x3b   :  { %1032 = vmatpush3.msra.mxu0 %v153_v34  ;;  %1067 = vmatpush3.msra.mxu1 %v185_v35  ;;  %v179_v59 = vld [vmem:[#allocation3 + $0x110] sm:$0xff]  ;;  %v146_v62 = vld [vmem:[#allocation3 + $0x8] sm:$0xff]  ;;  %v161_v0 = vld [vmem:[#allocation3 + $0x80] sm:$0xff] }
  0x3c   :  { %1033 = vmatprep.subr.mxu0 %v168_v36  ;;  %1068 = vmatprep.subr.mxu1 %v200_v37  ;;  %v178_v63 = vld [vmem:[#allocation3 + $0x108] sm:$0xff]  ;;  %v193_v1 = vld [vmem:[#allocation3 + $0x180] sm:$0xff]  ;;  %v240_v4 = vld [vmem:[#allocation3 + $0x2f8] sm:$0xff] }
  0x3d   :  { %1034 = vmatpush3.msra.mxu0 %v152_v38  ;;  %1069 = vmatpush3.msra.mxu1 %v184_v39  ;;  %v145_v2 = vld [vmem:[#allocation3] sm:$0xff]  ;;  %v272_v5 = vld [vmem:[#allocation3 + $0x3f8] sm:$0xff]  ;;  %v239_v18 = vld [vmem:[#allocation3 + $0x2f0] sm:$0xff] }
  0x3e   :  { %1035 = vmatprep.subr.mxu0 %v167_v40  ;;  %1070 = vmatprep.subr.mxu1 %v199_v41  ;;  %v177_v3 = vld [vmem:[#allocation3 + $0x100] sm:$0xff]  ;;  %v224_v15 = vld [vmem:[#allocation3 + $0x278] sm:$0xff]  ;;  %v271_v19 = vld [vmem:[#allocation3 + $0x3f0] sm:$0xff] }
  0x3f   :  { %1036 = vmatpush3.msra.mxu0 %v151_v42  ;;  %1071 = vmatpush3.msra.mxu1 %v183_v43  ;;  %v256_v17 = vld [vmem:[#allocation3 + $0x378] sm:$0xff]  ;;  %v223_v20 = vld [vmem:[#allocation3 + $0x270] sm:$0xff]  ;;  %v238_v22 = vld [vmem:[#allocation3 + $0x2e8] sm:$0xff] }
  0x40   :  { %1037 = vmatprep.subr.mxu0 %v166_v44  ;;  %1072 = vmatprep.subr.mxu1 %v198_v45  ;;  %v255_v21 = vld [vmem:[#allocation3 + $0x370] sm:$0xff]  ;;  %v270_v23 = vld [vmem:[#allocation3 + $0x3e8] sm:$0xff]  ;;  %v237_v26 = vld [vmem:[#allocation3 + $0x2e0] sm:$0xff] }
  0x41   :  { %1038 = vmatpush3.msra.mxu0 %v150_v46  ;;  %1073 = vmatpush3.msra.mxu1 %v182_v47  ;;  %v222_v24 = vld [vmem:[#allocation3 + $0x268] sm:$0xff]  ;;  %v269_v27 = vld [vmem:[#allocation3 + $0x3e0] sm:$0xff]  ;;  %v236_v30 = vld [vmem:[#allocation3 + $0x2d8] sm:$0xff] }
  0x42   :  { %1039 = vmatprep.subr.mxu0 %v165_v48  ;;  %1074 = vmatprep.subr.mxu1 %v197_v49  ;;  %v254_v25 = vld [vmem:[#allocation3 + $0x368] sm:$0xff]  ;;  %v221_v28 = vld [vmem:[#allocation3 + $0x260] sm:$0xff]  ;;  %v268_v31 = vld [vmem:[#allocation3 + $0x3d8] sm:$0xff] }
  0x43   :  { %1040 = vmatpush3.msra.mxu0 %v149_v50  ;;  %1075 = vmatpush3.msra.mxu1 %v181_v51  ;;  %v253_v29 = vld [vmem:[#allocation3 + $0x360] sm:$0xff]  ;;  %v220_v32 = vld [vmem:[#allocation3 + $0x258] sm:$0xff]  ;;  %v235_v34 = vld [vmem:[#allocation3 + $0x2d0] sm:$0xff] }
  0x44   :  { %1041 = vmatprep.subr.mxu0 %v164_v52  ;;  %1076 = vmatprep.subr.mxu1 %v196_v53  ;;  %v252_v33 = vld [vmem:[#allocation3 + $0x358] sm:$0xff]  ;;  %v267_v35 = vld [vmem:[#allocation3 + $0x3d0] sm:$0xff]  ;;  %v234_v38 = vld [vmem:[#allocation3 + $0x2c8] sm:$0xff] }
  0x45   :  { %1042 = vmatpush3.msra.mxu0 %v148_v54  ;;  %1077 = vmatpush3.msra.mxu1 %v180_v55  ;;  %v219_v36 = vld [vmem:[#allocation3 + $0x250] sm:$0xff]  ;;  %v266_v39 = vld [vmem:[#allocation3 + $0x3c8] sm:$0xff]  ;;  %v233_v42 = vld [vmem:[#allocation3 + $0x2c0] sm:$0xff] }
  0x46   :  { %1043 = vmatprep.subr.mxu0 %v163_v56  ;;  %1078 = vmatprep.subr.mxu1 %v195_v57  ;;  %v251_v37 = vld [vmem:[#allocation3 + $0x350] sm:$0xff]  ;;  %v218_v40 = vld [vmem:[#allocation3 + $0x248] sm:$0xff]  ;;  %v265_v43 = vld [vmem:[#allocation3 + $0x3c0] sm:$0xff] }
  0x47   :  { %1044 = vmatpush3.msra.mxu0 %v147_v58  ;;  %1079 = vmatpush3.msra.mxu1 %v179_v59  ;;  %v250_v41 = vld [vmem:[#allocation3 + $0x348] sm:$0xff]  ;;  %v217_v44 = vld [vmem:[#allocation3 + $0x240] sm:$0xff]  ;;  %v232_v46 = vld [vmem:[#allocation3 + $0x2b8] sm:$0xff] }
  0x48   :  { %1045 = vmatprep.subr.mxu0 %v162_v60  ;;  %1080 = vmatprep.subr.mxu1 %v194_v61  ;;  %v249_v45 = vld [vmem:[#allocation3 + $0x340] sm:$0xff]  ;;  %v264_v47 = vld [vmem:[#allocation3 + $0x3b8] sm:$0xff]  ;;  %v231_v50 = vld [vmem:[#allocation3 + $0x2b0] sm:$0xff] }
  0x49   :  { %1046 = vmatpush3.msra.mxu0 %v146_v62  ;;  %1081 = vmatpush3.msra.mxu1 %v178_v63  ;;  %v216_v48 = vld [vmem:[#allocation3 + $0x238] sm:$0xff]  ;;  %v263_v51 = vld [vmem:[#allocation3 + $0x3b0] sm:$0xff]  ;;  %v230_v54 = vld [vmem:[#allocation3 + $0x2a8] sm:$0xff] }
  0x4a   :  { %1047 = vmatprep.subr.mxu0 %v161_v0  ;;  %1082 = vmatprep.subr.mxu1 %v193_v1  ;;  %v248_v49 = vld [vmem:[#allocation3 + $0x338] sm:$0xff]  ;;  %v215_v52 = vld [vmem:[#allocation3 + $0x230] sm:$0xff]  ;;  %v262_v55 = vld [vmem:[#allocation3 + $0x3a8] sm:$0xff] }
  0x4b   :  { %1048 = vmatpush3.msra.mxu0 %v145_v2  ;;  %1083 = vmatpush3.msra.mxu1 %v177_v3  ;;  %v247_v53 = vld [vmem:[#allocation3 + $0x330] sm:$0xff]  ;;  %v214_v56 = vld [vmem:[#allocation3 + $0x228] sm:$0xff]  ;;  %v229_v58 = vld [vmem:[#allocation3 + $0x2a0] sm:$0xff] }
  0x4c   :  { %1087 = vmatprep.subr.mxu0 %v240_v4  ;;  %1122 = vmatprep.subr.mxu1 %v272_v5  ;;  %v246_v57 = vld [vmem:[#allocation3 + $0x328] sm:$0xff]  ;;  %v261_v59 = vld [vmem:[#allocation3 + $0x3a0] sm:$0xff]  ;;  %v228_v62 = vld [vmem:[#allocation3 + $0x298] sm:$0xff] }
  0x4d   :  { %v213_v60 = vld [vmem:[#allocation3 + $0x220] sm:$0xff]  ;;  %v260_v63 = vld [vmem:[#allocation3 + $0x398] sm:$0xff]  ;;  %v227_v2 = vld [vmem:[#allocation3 + $0x290] sm:$0xff] }
  0x4e   :  { %v245_v61 = vld [vmem:[#allocation3 + $0x320] sm:$0xff]  ;;  %v212_v0 = vld [vmem:[#allocation3 + $0x218] sm:$0xff]  ;;  %v259_v3 = vld [vmem:[#allocation3 + $0x390] sm:$0xff] }
  0x4f   :  { %v244_v1 = vld [vmem:[#allocation3 + $0x318] sm:$0xff]  ;;  %v211_v4 = vld [vmem:[#allocation3 + $0x210] sm:$0xff]  ;;  %v226_v6 = vld [vmem:[#allocation3 + $0x288] sm:$0xff] }
  0x50   :  { %v243_v5 = vld [vmem:[#allocation3 + $0x310] sm:$0xff] }
  0xa4   :  { %v1491_v8 = vpop.permute.xlu0 %95 }
  0xa5   :  { %vm98_vm0 = vcmp.eq.s32.totalorder %v83_v9, %v1491_v8  ;;  %vm100_vm5 = vcmp.eq.s32.totalorder %v85_v10, %v1491_v8  ;;  %vm97_vm8 = vcmp.eq.s32.totalorder %v1489_v7, %v1491_v8  ;;  %vm99_vm10 = vcmp.eq.s32.totalorder %v84_v12, %v1491_v8 }
  0xa6   :  { %vm102_vm14 = vcmp.eq.s32.totalorder %v87_v13, %v1491_v8 }
  0xaa   :  { %v1495_v11 = vpop.permute.xlu0 %110 }
  0xab   :  { %vm113_vm1 = vcmp.eq.s32.totalorder %v83_v9, %v1495_v11  ;;  %vm115_vm2 = vcmp.eq.s32.totalorder %v85_v10, %v1495_v11  ;;  %vm112_vm3 = vcmp.eq.s32.totalorder %v1489_v7, %v1495_v11  ;;  %vm114_vm6 = vcmp.eq.s32.totalorder %v84_v12, %v1495_v11  ;;  %v258_v9 = vld [vmem:[#allocation3 + $0x388] sm:$0xff] }
  0xac   :  { %vm124_vm4 = vmor %vm98_vm0, %vm113_vm1  ;;  %vm117_vm11 = vcmp.eq.s32.totalorder %v87_v13, %v1495_v11  ;;  %vm119_vm13 = vcmp.eq.s32.totalorder %v89_v16, %v1495_v11  ;;  %vm104_vm0 = vcmp.eq.s32.totalorder %v89_v16, %v1491_v8  ;;  %v210_v10 = vld [vmem:[#allocation3 + $0x208] sm:$0xff]  ;;  %v86_v12 = vadd.s32 512, %v1489_v7 }
  0xad   :  { %999 = vmatprep.mubr.msk.f32.mxu0 %vm124_vm4, %v1407_v14  ;;  %vm126_vm7 = vmor %vm100_vm5, %vm115_vm2  ;;  %v242_v13 = vld [vmem:[#allocation3 + $0x308] sm:$0xff]  ;;  %v88_v16 = vadd.s32 768, %v1489_v7 }
  0xae   :  { %1001 = vmatprep.mubr.msk.f32.mxu1 %vm126_vm7, %v1407_v14  ;;  %vm123_vm9 = vmor %vm97_vm8, %vm112_vm3  ;;  %vm116_vm2 = vcmp.eq.s32.totalorder %v86_v12, %v1495_v11  ;;  %vm101_vm4 = vcmp.eq.s32.totalorder %v86_v12, %v1491_v8  ;;  %v751_v12 = vld [vmem:[#allocation5 + $0x50] sm:$0xff] }
  0xaf   :  { %1000 = vmatmul.mubr.msk.f32.vlgmr.msra.gmra.mxu0 %vm123_vm9, %v1407_v14  ;;  %vm125_vm12 = vmor %vm99_vm10, %vm114_vm6  ;;  %vm118_vm3 = vcmp.eq.s32.totalorder %v88_v16, %v1495_v11  ;;  %vm103_vm6 = vcmp.eq.s32.totalorder %v88_v16, %v1491_v8  ;;  %v748_v16 = vld [vmem:[#allocation5 + $0x38] sm:$0xff] }
  0xb0   :  { %1002 = vmatmul.mubr.msk.f32.vlgmr.msra.gmra.mxu1 %vm125_vm12, %v1407_v14  ;;  %1088 = vmatpush3.msra.mxu0 %v224_v15  ;;  %vm128_vm15 = vmor %vm102_vm14, %vm117_vm11  ;;  %v225_v15 = vld [vmem:[#allocation3 + $0x280] sm:$0xff] }
  0xb1   :  { %1123 = vmatpush3.msra.mxu1 %v256_v17  ;;  %1089 = vmatprep.subr.mxu0 %v239_v18  ;;  %vm130_vm1 = vmor %vm104_vm0, %vm119_vm13  ;;  %v257_v17 = vld [vmem:[#allocation3 + $0x380] sm:$0xff]  ;;  %vm1409_vm0 = vmmov 0  }
  0xb2   :  { %1003 = vmatprep.mubr.msk.f32.mxu0 %vm128_vm15, %v1407_v14  ;;  %1124 = vmatprep.subr.mxu1 %v271_v19  ;;  %v209_v18 = vld [vmem:[#allocation3 + $0x200] sm:$0xff]  ;;  %vm127_vm5 = vmor %vm101_vm4, %vm116_vm2  ;;  %vm839_vm2 = vcmask 523264  }
  0xb3   :  { %1005 = vmatprep.mubr.msk.f32.mxu1 %vm130_vm1, %v1407_v14  ;;  %1090 = vmatpush3.msra.mxu0 %v223_v20  ;;  %v241_v19 = vld [vmem:[#allocation3 + $0x300] sm:$0xff]  ;;  %v91_v20 = vadd.s32 1152, %v1489_v7  ;;  %vm129_vm8 = vmor %vm103_vm6, %vm118_vm3  ;;  %vm991_vm3 = vcmask 7168  }
  0xb4   :  { %1125 = vmatpush3.msra.mxu1 %v255_v21  ;;  %1091 = vmatprep.subr.mxu0 %v238_v22  ;;  %v304_v21 = vld [vmem:[#allocation3 + $0x4f8] sm:$0xff] }
  0xb5   :  { %1126 = vmatprep.subr.mxu1 %v270_v23  ;;  %1092 = vmatpush3.msra.mxu0 %v222_v24  ;;  %v288_v22 = vld [vmem:[#allocation3 + $0x478] sm:$0xff]  ;;  %vm121_vm7 = vcmp.eq.s32.totalorder %v91_v20, %v1495_v11  ;;  %vm106_vm9 = vcmp.eq.s32.totalorder %v91_v20, %v1491_v8  ;;  %v303_v24 = vld [vmem:[#allocation3 + $0x4f0] sm:$0xff] }
  0xb6   :  { %1127 = vmatpush3.msra.mxu1 %v254_v25  ;;  %1093 = vmatprep.subr.mxu0 %v237_v26  ;;  %v320_v23 = vld [vmem:[#allocation3 + $0x578] sm:$0xff]  ;;  %v1408_v25 = vmov 0.0   ;;  %vm132_vm10 = vmor %vm106_vm9, %vm121_vm7  ;;  %v287_v26 = vld [vmem:[#allocation3 + $0x470] sm:$0xff] }
  0xb7   :  { %1128 = vmatprep.subr.mxu1 %v269_v27  ;;  %1094 = vmatpush3.msra.mxu0 %v221_v28  ;;  %v319_v27 = vld [vmem:[#allocation3 + $0x570] sm:$0xff]  ;;  %v302_v28 = vld [vmem:[#allocation3 + $0x4e8] sm:$0xff]  ;;  %v744_v20 = vld [vmem:[#allocation5 + $0x18] sm:$0xff] }
  0xb8   :  { %1129 = vmatpush3.msra.mxu1 %v253_v29  ;;  %1095 = vmatprep.subr.mxu0 %v236_v30  ;;  %v286_v29 = vld [vmem:[#allocation3 + $0x468] sm:$0xff] }
  0xb9   :  { %1130 = vmatprep.subr.mxu1 %v268_v31  ;;  %1096 = vmatpush3.msra.mxu0 %v220_v32  ;;  %v318_v30 = vld [vmem:[#allocation3 + $0x568] sm:$0xff]  ;;  %v301_v31 = vld [vmem:[#allocation3 + $0x4e0] sm:$0xff] }
  0xba   :  { %1131 = vmatpush3.msra.mxu1 %v252_v33  ;;  %1097 = vmatprep.subr.mxu0 %v235_v34  ;;  %v285_v32 = vld [vmem:[#allocation3 + $0x460] sm:$0xff]  ;;  %v300_v34 = vld [vmem:[#allocation3 + $0x4d8] sm:$0xff] }
  0xbb   :  { %1132 = vmatprep.subr.mxu1 %v267_v35  ;;  %1098 = vmatpush3.msra.mxu0 %v219_v36  ;;  %v317_v33 = vld [vmem:[#allocation3 + $0x560] sm:$0xff]  ;;  %v284_v35 = vld [vmem:[#allocation3 + $0x458] sm:$0xff] }
  0xbc   :  { %1133 = vmatpush3.msra.mxu1 %v251_v37  ;;  %1099 = vmatprep.subr.mxu0 %v234_v38  ;;  %v316_v36 = vld [vmem:[#allocation3 + $0x558] sm:$0xff]  ;;  %v299_v37 = vld [vmem:[#allocation3 + $0x4d0] sm:$0xff] }
  0xbd   :  { %1134 = vmatprep.subr.mxu1 %v266_v39  ;;  %1100 = vmatpush3.msra.mxu0 %v218_v40  ;;  %v283_v38 = vld [vmem:[#allocation3 + $0x450] sm:$0xff]  ;;  %v298_v40 = vld [vmem:[#allocation3 + $0x4c8] sm:$0xff] }
  0xbe   :  { %1135 = vmatpush3.msra.mxu1 %v250_v41  ;;  %1101 = vmatprep.subr.mxu0 %v233_v42  ;;  %v315_v39 = vld [vmem:[#allocation3 + $0x550] sm:$0xff]  ;;  %v282_v41 = vld [vmem:[#allocation3 + $0x448] sm:$0xff] }
  0xbf   :  { %1136 = vmatprep.subr.mxu1 %v265_v43  ;;  %1102 = vmatpush3.msra.mxu0 %v217_v44  ;;  %v314_v42 = vld [vmem:[#allocation3 + $0x548] sm:$0xff]  ;;  %v297_v43 = vld [vmem:[#allocation3 + $0x4c0] sm:$0xff] }
  0xc0   :  { %1137 = vmatpush3.msra.mxu1 %v249_v45  ;;  %1103 = vmatprep.subr.mxu0 %v232_v46  ;;  %v281_v44 = vld [vmem:[#allocation3 + $0x440] sm:$0xff]  ;;  %v296_v46 = vld [vmem:[#allocation3 + $0x4b8] sm:$0xff] }
  0xc1   :  { %1138 = vmatprep.subr.mxu1 %v264_v47  ;;  %1104 = vmatpush3.msra.mxu0 %v216_v48  ;;  %v313_v45 = vld [vmem:[#allocation3 + $0x540] sm:$0xff]  ;;  %v280_v47 = vld [vmem:[#allocation3 + $0x438] sm:$0xff] }
  0xc2   :  { %1139 = vmatpush3.msra.mxu1 %v248_v49  ;;  %1105 = vmatprep.subr.mxu0 %v231_v50  ;;  %v312_v48 = vld [vmem:[#allocation3 + $0x538] sm:$0xff]  ;;  %v295_v49 = vld [vmem:[#allocation3 + $0x4b0] sm:$0xff] }
  0xc3   :  { %1140 = vmatprep.subr.mxu1 %v263_v51  ;;  %1106 = vmatpush3.msra.mxu0 %v215_v52  ;;  %v279_v50 = vld [vmem:[#allocation3 + $0x430] sm:$0xff]  ;;  %v294_v52 = vld [vmem:[#allocation3 + $0x4a8] sm:$0xff] }
  0xc4   :  { %1141 = vmatpush3.msra.mxu1 %v247_v53  ;;  %1107 = vmatprep.subr.mxu0 %v230_v54  ;;  %v311_v51 = vld [vmem:[#allocation3 + $0x530] sm:$0xff]  ;;  %v278_v53 = vld [vmem:[#allocation3 + $0x428] sm:$0xff] }
  0xc5   :  { %1142 = vmatprep.subr.mxu1 %v262_v55  ;;  %1108 = vmatpush3.msra.mxu0 %v214_v56  ;;  %v310_v54 = vld [vmem:[#allocation3 + $0x528] sm:$0xff]  ;;  %v293_v55 = vld [vmem:[#allocation3 + $0x4a0] sm:$0xff] }
  0xc6   :  { %1143 = vmatpush3.msra.mxu1 %v246_v57  ;;  %1109 = vmatprep.subr.mxu0 %v229_v58  ;;  %v277_v56 = vld [vmem:[#allocation3 + $0x420] sm:$0xff]  ;;  %v292_v58 = vld [vmem:[#allocation3 + $0x498] sm:$0xff] }
  0xc7   :  { %1144 = vmatprep.subr.mxu1 %v261_v59  ;;  %1110 = vmatpush3.msra.mxu0 %v213_v60  ;;  %v309_v57 = vld [vmem:[#allocation3 + $0x520] sm:$0xff]  ;;  %v276_v59 = vld [vmem:[#allocation3 + $0x418] sm:$0xff] }
  0xc8   :  { %1145 = vmatpush3.msra.mxu1 %v245_v61  ;;  %1111 = vmatprep.subr.mxu0 %v228_v62  ;;  %v308_v60 = vld [vmem:[#allocation3 + $0x518] sm:$0xff]  ;;  %v291_v61 = vld [vmem:[#allocation3 + $0x490] sm:$0xff] }
  0xc9   :  { %1146 = vmatprep.subr.mxu1 %v260_v63  ;;  %1112 = vmatpush3.msra.mxu0 %v212_v0  ;;  %v275_v62 = vld [vmem:[#allocation3 + $0x410] sm:$0xff]  ;;  %v290_v0 = vld [vmem:[#allocation3 + $0x488] sm:$0xff] }
  0xca   :  { %1147 = vmatpush3.msra.mxu1 %v244_v1  ;;  %1113 = vmatprep.subr.mxu0 %v227_v2  ;;  %v307_v63 = vld [vmem:[#allocation3 + $0x510] sm:$0xff]  ;;  %v274_v1 = vld [vmem:[#allocation3 + $0x408] sm:$0xff] }
  0xcb   :  { %1148 = vmatprep.subr.mxu1 %v259_v3  ;;  %1114 = vmatpush3.msra.mxu0 %v211_v4  ;;  %v306_v2 = vld [vmem:[#allocation3 + $0x508] sm:$0xff]  ;;  %v90_v3 = vadd.s32 1024, %v1489_v7  ;;  %v289_v4 = vld [vmem:[#allocation3 + $0x480] sm:$0xff] }
  0xcc   :  { %1149 = vmatpush3.msra.mxu1 %v243_v5  ;;  %1115 = vmatprep.subr.mxu0 %v226_v6  ;;  %v92_v5 = vadd.s32 1280, %v1489_v7  ;;  %v273_v6 = vld [vmem:[#allocation3 + $0x400] sm:$0xff]  ;;  %v756_v7 = vld [vmem:[#allocation5 + $0x78] sm:$0xff] }
  0xcd   :  { %1150 = vmatprep.subr.mxu1 %v258_v9  ;;  %1116 = vmatpush3.msra.mxu0 %v210_v10  ;;  %v305_v9 = vld [vmem:[#allocation3 + $0x500] sm:$0xff]  ;;  %vm120_vm11 = vcmp.eq.s32.totalorder %v90_v3, %v1495_v11  ;;  %vm105_vm13 = vcmp.eq.s32.totalorder %v90_v3, %v1491_v8  ;;  %v884_v3 = vld [vmem:[#allocation7 + $0x8] sm:$0xff] }
  0xce   :  { %1151 = vmatpush3.msra.mxu1 %v242_v13  ;;  %1117 = vmatprep.subr.mxu0 %v225_v15  ;;  %vm122_vm12 = vcmp.eq.s32.totalorder %v92_v5, %v1495_v11  ;;  %vm131_vm14 = vmor %vm105_vm13, %vm120_vm11  ;;  %vm107_vm15 = vcmp.eq.s32.totalorder %v92_v5, %v1491_v8  ;;  %v755_v11 = vld [vmem:[#allocation5 + $0x70] sm:$0xff]  ;;  %v754_v8 = vld [vmem:[#allocation5 + $0x68] sm:$0xff] }
  0xcf   :  { %1152 = vmatprep.subr.mxu1 %v257_v17  ;;  %1118 = vmatpush3.msra.mxu0 %v209_v18  ;;  %vm133_vm1 = vmor %vm107_vm15, %vm122_vm12  ;;  %v753_v10 = vld [vmem:[#allocation5 + $0x60] sm:$0xff]  ;;  %v750_v13 = vld [vmem:[#allocation5 + $0x48] sm:$0xff] }
  0xd0   :  { %1153 = vmatpush3.msra.mxu1 %v241_v19  ;;  %1004 = vmatmul.mubr.msk.f32.vlgmr.msra.gmra.mxu0 %vm127_vm5, %v1407_v14  ;;  %v749_v15 = vld [vmem:[#allocation5 + $0x40] sm:$0xff]  ;;  %v747_v17 = vld [vmem:[#allocation5 + $0x30] sm:$0xff]  ;;  %v746_v18 = vld [vmem:[#allocation5 + $0x28] sm:$0xff] }
  0xd1   :  { %1006 = vmatmul.mubr.msk.f32.vlgmr.msra.gmra.mxu1 %vm129_vm8, %v1407_v14  ;;  %1157 = vmatprep.subr.mxu0 %v304_v21  ;;  %v745_v19 = vld [vmem:[#allocation5 + $0x20] sm:$0xff]  ;;  %v743_v21 = vld [vmem:[#allocation5 + $0x10] sm:$0xff] }
  0xd2   :  { %1235 = vmatprep.subr.mxu1 %v1408_v25  ;;  %1158 = vmatpush3.msra.mxu0 %v288_v22  ;;  %v742_v22 = vld [vmem:[#allocation5 + $0x8] sm:$0xff] }
  0xd3   :  { %1007 = vmatprep.mubr.msk.f32.mxu0 %vm132_vm10, %v1407_v14  ;;  %1236 = vmatpush3.msra.mxu1 %v320_v23  ;;  %v741_v23 = vld [vmem:[#allocation5] sm:$0xff] }
  0xd4   :  { %1159 = vmatprep.subr.mxu0 %v303_v24  ;;  %1237 = vmatprep.subr.mxu1 %v1408_v25 }
  0xd5   :  { %1160 = vmatpush3.msra.mxu0 %v287_v26  ;;  %1238 = vmatpush3.msra.mxu1 %v319_v27 }
  0xd6   :  { %1161 = vmatprep.subr.mxu0 %v302_v28  ;;  %1239 = vmatprep.subr.mxu1 %v1408_v25 }
  0xd7   :  { %1162 = vmatpush3.msra.mxu0 %v286_v29  ;;  %1240 = vmatpush3.msra.mxu1 %v318_v30 }
  0xd8   :  { %1163 = vmatprep.subr.mxu0 %v301_v31  ;;  %1241 = vmatprep.subr.mxu1 %v1408_v25 }
  0xd9   :  { %1164 = vmatpush3.msra.mxu0 %v285_v32  ;;  %1242 = vmatpush3.msra.mxu1 %v317_v33 }
  0xda   :  { %1165 = vmatprep.subr.mxu0 %v300_v34  ;;  %1243 = vmatprep.subr.mxu1 %v1408_v25 }
  0xdb   :  { %1166 = vmatpush3.msra.mxu0 %v284_v35  ;;  %1244 = vmatpush3.msra.mxu1 %v316_v36 }
  0xdc   :  { %1167 = vmatprep.subr.mxu0 %v299_v37  ;;  %1245 = vmatprep.subr.mxu1 %v1408_v25 }
  0xdd   :  { %1168 = vmatpush3.msra.mxu0 %v283_v38  ;;  %1246 = vmatpush3.msra.mxu1 %v315_v39 }
  0xde   :  { %1169 = vmatprep.subr.mxu0 %v298_v40  ;;  %1247 = vmatprep.subr.mxu1 %v1408_v25 }
  0xdf   :  { %1170 = vmatpush3.msra.mxu0 %v282_v41  ;;  %1248 = vmatpush3.msra.mxu1 %v314_v42 }
  0xe0   :  { %1171 = vmatprep.subr.mxu0 %v297_v43  ;;  %1249 = vmatprep.subr.mxu1 %v1408_v25 }
  0xe1   :  { %1172 = vmatpush3.msra.mxu0 %v281_v44  ;;  %1250 = vmatpush3.msra.mxu1 %v313_v45 }
  0xe2   :  { %1173 = vmatprep.subr.mxu0 %v296_v46  ;;  %1251 = vmatprep.subr.mxu1 %v1408_v25 }
  0xe3   :  { %1174 = vmatpush3.msra.mxu0 %v280_v47  ;;  %1252 = vmatpush3.msra.mxu1 %v312_v48  ;;  %v1010_v47 = vld [vmem:[%s1616_s4] ss:$0 sm:$0xff] }
  0xe4   :  { %1175 = vmatprep.subr.mxu0 %v295_v49  ;;  %1253 = vmatprep.subr.mxu1 %v1408_v25 }
  0xe5   :  { %1176 = vmatpush3.msra.mxu0 %v279_v50  ;;  %1254 = vmatpush3.msra.mxu1 %v311_v51 }
  0xe6   :  { %1177 = vmatprep.subr.mxu0 %v294_v52  ;;  %1255 = vmatprep.subr.mxu1 %v1408_v25 }
  0xe7   :  { %1178 = vmatpush3.msra.mxu0 %v278_v53  ;;  %1256 = vmatpush3.msra.mxu1 %v310_v54  ;;  %v1011_v53 = vld [vmem:[%s1617_s5] ss:$0 sm:$0xff] }
  0xe8   :  { %1179 = vmatprep.subr.mxu0 %v293_v55  ;;  %1257 = vmatprep.subr.mxu1 %v1408_v25 }
  0xe9   :  { %1180 = vmatpush3.msra.mxu0 %v277_v56  ;;  %1258 = vmatpush3.msra.mxu1 %v309_v57 }
  0xea   :  { %1181 = vmatprep.subr.mxu0 %v292_v58  ;;  %1259 = vmatprep.subr.mxu1 %v1408_v25 }
  0xeb   :  { %1182 = vmatpush3.msra.mxu0 %v276_v59  ;;  %1260 = vmatpush3.msra.mxu1 %v308_v60  ;;  %v1012_v60 = vld [vmem:[%s1618_s6] ss:$0 sm:$0xff] }
  0xec   :  { %1183 = vmatprep.subr.mxu0 %v291_v61  ;;  %1261 = vmatprep.subr.mxu1 %v1408_v25  ;;  %v890_v61 = vld [vmem:[#allocation7 + $0x38] sm:$0xff] }
  0xed   :  { %1184 = vmatpush3.msra.mxu0 %v275_v62  ;;  %1262 = vmatpush3.msra.mxu1 %v307_v63  ;;  %v889_v62 = vld [vmem:[#allocation7 + $0x30] sm:$0xff]  ;;  %v888_v63 = vld [vmem:[#allocation7 + $0x28] sm:$0xff] }
  0xee   :  { %1185 = vmatprep.subr.mxu0 %v290_v0  ;;  %1263 = vmatprep.subr.mxu1 %v1408_v25  ;;  %v887_v0 = vld [vmem:[#allocation7 + $0x20] sm:$0xff] }
  0xef   :  { %1186 = vmatpush3.msra.mxu0 %v274_v1  ;;  %1264 = vmatpush3.msra.mxu1 %v306_v2  ;;  %v886_v1 = vld [vmem:[#allocation7 + $0x18] sm:$0xff]  ;;  %v885_v2 = vld [vmem:[#allocation7 + $0x10] sm:$0xff] }
  0xf0   :  { %1187 = vmatprep.subr.mxu0 %v289_v4  ;;  %1265 = vmatprep.subr.mxu1 %v1408_v25 }
  0xf1   :  { %1188 = vmatpush3.msra.mxu0 %v273_v6  ;;  %1266 = vmatpush3.msra.mxu1 %v305_v9  ;;  %v883_v9 = vld [vmem:[#allocation7] sm:$0xff] }
  0xf2   :  { %1267 = vmatprep.mubr.msk.f32.mxu1 %vm1409_vm0, %v1408_v25  ;;  %1008 = vmatmul.mubr.msk.f32.vlgmr.msra.gmra.mxu0 %vm131_vm14, %v1407_v14 }
  0xf3   :  { %1268 = vmatmul.mubr.msk.f32.vlgmr.msra.gmra.mxu1 %vm133_vm1, %v1407_v14  ;;  %1270 = vmatprep.subr.mxu0 %v1408_v25  ;;  %v752_v14 = vld [vmem:[#allocation5 + $0x58] sm:$0xff] }
  0xf4   :  { %1302 = vmatprep.mubr.msk.f32.mxu0 %vm1409_vm0, %v1408_v25  ;;  %1305 = vmatprep.subr.mxu1 %v1408_v25 }
  0xf5   :  { %1321 = vmatprep.mubr.msk.f32.mxu1 %vm1409_vm0, %v1408_v25  ;;  %1271 = vmatpush3.msra.mxu0 %v756_v7 }
  0xf6   :  { %1272 = vmatprep.subr.mxu0 %v1408_v25  ;;  %1306 = vmatpush3.msra.mxu1 %v890_v61 }
  0xf7   :  { %1273 = vmatpush3.msra.mxu0 %v755_v11  ;;  %1307 = vmatprep.subr.mxu1 %v1408_v25 }
  0xf8   :  { %1274 = vmatprep.subr.mxu0 %v1408_v25  ;;  %1308 = vmatpush3.msra.mxu1 %v889_v62 }
  0xf9   :  { %1275 = vmatpush3.msra.mxu0 %v754_v8  ;;  %1309 = vmatprep.subr.mxu1 %v1408_v25 }
  0xfa   :  { %1276 = vmatprep.subr.mxu0 %v1408_v25  ;;  %1310 = vmatpush3.msra.mxu1 %v888_v63 }
  0xfb   :  { %1277 = vmatpush3.msra.mxu0 %v753_v10  ;;  %1311 = vmatprep.subr.mxu1 %v1408_v25 }
  0xfc   :  { %1278 = vmatprep.subr.mxu0 %v1408_v25  ;;  %1312 = vmatpush3.msra.mxu1 %v887_v0 }
  0xfd   :  { %1279 = vmatpush3.msra.mxu0 %v752_v14  ;;  %1313 = vmatprep.subr.mxu1 %v1408_v25 }
  0xfe   :  { %1280 = vmatprep.subr.mxu0 %v1408_v25  ;;  %1314 = vmatpush3.msra.mxu1 %v886_v1 }
  0xff   :  { %1281 = vmatpush3.msra.mxu0 %v751_v12  ;;  %1315 = vmatprep.subr.mxu1 %v1408_v25 }
 0x100   :  { %1282 = vmatprep.subr.mxu0 %v1408_v25  ;;  %1316 = vmatpush3.msra.mxu1 %v885_v2 }
 0x101   :  { %1283 = vmatpush3.msra.mxu0 %v750_v13  ;;  %1317 = vmatprep.subr.mxu1 %v1408_v25 }
 0x102   :  { %1284 = vmatprep.subr.mxu0 %v1408_v25  ;;  %1318 = vmatpush3.msra.mxu1 %v884_v3 }
 0x103   :  { %1285 = vmatpush3.msra.mxu0 %v749_v15  ;;  %1319 = vmatprep.subr.mxu1 %v1408_v25 }
 0x104   :  { %1286 = vmatprep.subr.mxu0 %v1408_v25  ;;  %1320 = vmatpush3.msra.mxu1 %v883_v9 }
 0x105   :  { %1287 = vmatpush3.msra.mxu0 %v748_v16 }
 0x106   :  { %1288 = vmatprep.subr.mxu0 %v1408_v25 }
 0x107   :  { %1289 = vmatpush3.msra.mxu0 %v747_v17 }
 0x108   :  { %1290 = vmatprep.subr.mxu0 %v1408_v25 }
 0x109   :  { %1291 = vmatpush3.msra.mxu0 %v746_v18 }
 0x10a   :  { %1292 = vmatprep.subr.mxu0 %v1408_v25 }
 0x10b   :  { %1293 = vmatpush3.msra.mxu0 %v745_v19 }
 0x10c   :  { %1294 = vmatprep.subr.mxu0 %v1408_v25 }
 0x10d   :  { %1295 = vmatpush3.msra.mxu0 %v744_v20  ;;  %v1015_v20 = vld [vmem:[%s1621_s9] ss:$0 sm:$0xff] }
 0x10e   :  { %1296 = vmatprep.subr.mxu0 %v1408_v25 }
 0x10f   :  { %1297 = vmatpush3.msra.mxu0 %v743_v21 }
 0x110   :  { %1298 = vmatprep.subr.mxu0 %v1408_v25 }
 0x111   :  { %1299 = vmatpush3.msra.mxu0 %v742_v22 }
 0x112   :  { %1300 = vmatprep.subr.mxu0 %v1408_v25  ;;  %v1013_v25 = vld [vmem:[%s1620_s8] ss:$0 sm:$0xff] }
 0x113   :  { %1301 = vmatpush3.msra.mxu0 %v741_v23 }
 0x16f   :  { %v1049_v24 = vpop.f32.mrf.mxu0 }
 0x170   :  { %v1084_v26 = vpop.f32.mrf.mxu1 }
 0x171   :  { %v1050_v27 = vpop.f32.mrf.mxu0 }
 0x172   :  { %v1085_v29 = vpop.f32.mrf.mxu1  ;;  %v1051_v31 = vadd.f32 %v1050_v27, %v1049_v24  ;;  %v1016_v24 = vld [vmem:[#allocation2] ss:$0 sm:$0xff] }
 0x173   :  { %v1086_v32 = vadd.f32 %v1085_v29, %v1084_v26 }
 0x175   :  { %v458_v35 = vadd.f32 %v1086_v32, %v1051_v31 }
 0x190   :  { %v1119_v28 = vpop.f32.mrf.mxu0 }
 0x191   :  { %v1154_v33 = vpop.f32.mrf.mxu1 }
 0x192   :  { %v1120_v30 = vpop.f32.mrf.mxu0 }
 0x193   :  { %v1121_v34 = vadd.f32 %v1120_v30, %v1119_v28  ;;  %v1155_v36 = vpop.f32.mrf.mxu1 }
 0x194   :  { %v1156_v39 = vadd.f32 %v1155_v36, %v1154_v33 }
 0x195   :  { %v528_v37 = vadd.f32 %v1121_v34, %v458_v35 }
 0x197   :  { %v598_v42 = vadd.f32 %v1156_v39, %v528_v37 }
 0x1b2   :  { %v1189_v38 = vpop.f32.mrf.mxu0 }
 0x1b3   :  { %v737_v40 = vpop.f32.mrf.mxu1 }
 0x1b4   :  { %v1190_v41 = vpop.f32.mrf.mxu0 }
 0x1b5   :  { %v1191_v43 = vadd.f32 %v1190_v41, %v1189_v38  ;;  %v1269_v44 = vpop.f32.mrf.mxu1 }
 0x1b7   :  { %v668_v45 = vadd.f32 %v1191_v43, %v598_v42 }
 0x1b9   :  { %v738_v46 = vadd.f32 %v737_v40, %v668_v45 }
 0x1bb   :  { %1303 = vmatmul.mubr.f32.vlgmr.msra.gmra.mxu0 %v738_v46 }
 0x27b   :  { %v830_v48 = vpop.f32.mrf.mxu0 }
 0x27c   :  { %v831_v49 = vadd.f32 %v1010_v47, %v830_v48 }
 0x27d   :  { %v1304_v50 = vpop.f32.mrf.mxu0 }
 0x27e   :  { %836 = vrot.lane.b32.xlu1 %v831_v49, %s1410_s7  ;;  %v834_v13 = vmax.f32 %v831_v49, 0.0 }
 0x2f0   :  { %v837_v51 = vpop.permute.xlu1 %836 }
 0x2f1   :  { %v840_v52 = vsel %vm839_vm2, %v837_v51, 0.0 }
 0x2f2   :  { %841 = vadd.xlane.f32.xlu1 %v840_v52 }
 0x303   :  { %864 = vrot.lane.b32.xlu1 %v1011_v53, %s1410_s7 }
 0x37b   :  { %v842_v54 = vpop.xlane.xlu1 %841 }
 0x37c   :  { %v844_v55 = vmul.f32 0.015625, %v842_v54 }
 0x37e   :  { %v845_v56 = vsub.f32 %v831_v49, %v844_v55 }
 0x37f   :  { %v865_v11 = vpop.permute.xlu1 %864 }
 0x380   :  { %v846_v57 = vmul.f32 %v845_v56, %v845_v56 }
 0x382   :  { %848 = vrot.lane.b32.xlu0 %v846_v57, %s1410_s7 }
 0x3f4   :  { %v849_v58 = vpop.permute.xlu0 %848 }
 0x3f5   :  { %v851_v59 = vsel %vm839_vm2, %v849_v58, 0.0 }
 0x3f6   :  { %852 = vadd.xlane.f32.xlu0 %v851_v59 }
 0x40c   :  { %874 = vrot.lane.b32.xlu0 %v1012_v60, %s1410_s7 }
 0x47f   :  { %v853_v4 = vpop.xlane.xlu0 %852 }
 0x480   :  { %v854_v5 = vmul.f32 0.015625, %v853_v4 }
 0x482   :  { %v855_v6 = vadd.f32 1e-05, %v854_v5 }
 0x483   :  { %v875_v10 = vpop.permute.xlu0 %874 }
 0x484   :  { %1335 = vrsqrt.f32 %v855_v6 }
 0x491   :  { %v1336_v7 = vpop.eup %1335 }
 0x492   :  { %v857_v8 = vmul.f32 %v1336_v7, %v845_v56 }
 0x494   :  { %v867_v14 = vmul.f32 %v865_v11, %v857_v8 }
 0x496   :  { %v877_v12 = vadd.f32 %v875_v10, %v867_v14 }
 0x498   :  { %879 = vrot.lane.b32.xlu1 %v877_v12, %s1410_s7 }
 0x50a   :  { %v880_v15 = vpop.permute.xlu1 %879 }
 0x50b   :  { %v882_v16 = vadd.f32 %v880_v15, %v834_v13 }
 0x50d   :  { %1322 = vmatmul.mubr.msk.f32.vlgmr.msra.gmra.mxu1 %vm839_vm2, %v882_v16 }
 0x5cd   :  { %v967_v17 = vpop.f32.mrf.mxu1 }
 0x5ce   :  { %v968_v18 = vadd.f32 %v1013_v25, %v967_v17 }
 0x5cf   :  { %v1323_v19 = vpop.f32.mrf.mxu1 }
 0x5d0   :  { %v971_v21 = vmax.f32 %v968_v18, 0.0 }
 0x5d2   :  { %v979_v22 = vmul.f32 %v1015_v20, %v971_v21 }
 0x5d4   :  { %v980_v23 = vsel %vm839_vm2, %v979_v22, 0.0 }
 0x5d5   :  { %981 = vadd.xlane.f32.xlu1 %v980_v23 }
 0x65e   :  { %v982_v26 = vpop.xlane.xlu1 %981 }
 0x65f   :  { %v990_v27 = vadd.f32 %v1016_v24, %v982_v26 }
 0x661   :  { %992 = vst.msk [vmem:[%s1623_s11] sm:$0xff] %vm991_vm3, %v990_v27 }
 0x662   :  { %997 = vsyncpa [#allocation4], 1 }
 0x663   :  { %998 = vsyncpa [#allocation6], 1 }

</bundles_post_ra>
